<compile_context>
chip_gen: v6e
topology: v6e:2x2x1
jax: 0.10.0
libtpu: 0.0.40
codegen_flags: <defaults>
</compile_context>

<pallas_src>
import jax
import jax.numpy as jnp
from jax.experimental import pallas as pl
from jax.experimental.pallas import tpu as pltpu


def odef_kernel(xT_ref, w1t_ref, b1_ref, w2t_ref, b2_ref, oT_ref):
    """Fused MLP, batch-on-lanes layout.

    xT_ref : [in_dim,   tb]        input tile (batch on lanes)
    w1t_ref: [hidden_p, in_dim]    layer-1 weight, transposed, hidden zero-padded
    b1_ref : [hidden_p, 1]         layer-1 bias column (zero-padded)
    w2t_ref: [out_dim,  hidden_p]  layer-2 weight, transposed, hidden zero-padded
    b2_ref : [out_dim,  1]         layer-2 bias column
    oT_ref : [out_dim,  tb]        output tile (batch on lanes -> lane-dense store)
    """
    xT = xT_ref[...].astype(jnp.float32)       # [in_dim, tb]
    w1t = w1t_ref[...].astype(jnp.float32)     # [hidden_p, in_dim]
    in_dim = xT.shape[0]

    # ---- Layer 1: K == in_dim (2) is far too small for the MXU; do it as
    # broadcast FMAs (outer-product accumulation) on the VPU, statically unrolled.
    hT = w1t[:, 0:1] * xT[0:1, :]              # [hidden_p, tb]
    for k in range(1, in_dim):                 # tiny static unroll
        hT = hT + w1t[:, k:k + 1] * xT[k:k + 1, :]
    hT = hT + b1_ref[...]                      # bias column broadcasts over lanes
    hT = jnp.maximum(hT, 0.0)                  # ReLU (zero-padded rows stay 0)

    # ---- Layer 2: K = hidden_p (256) is dense -> MXU; output lane dim = tb.
    yT = jnp.dot(w2t_ref[...].astype(jnp.float32), hT,
                 preferred_element_type=jnp.float32)   # [out_dim, tb]
    yT = yT + b2_ref[...]
    oT_ref[...] = yT.astype(oT_ref.dtype)


def prepare_params(w1, b1, w2, b2, *, pad_to=256):
    """Transpose to the kernel layout and zero-pad hidden up to a multiple of `pad_to`.

    Inputs follow the math  y = ReLU(x @ w1 + b1) @ w2 + b2:
      w1: [in_dim, hidden]   b1: [hidden]
      w2: [hidden, out_dim]  b2: [out_dim]
    Returns (w1t, b1c, w2t, b2c) in kernel layout with hidden padded (numerically inert).
    """
    in_dim, hidden = w1.shape
    out_dim = w2.shape[1]
    hidden_p = ((hidden + pad_to - 1) // pad_to) * pad_to
    pad = hidden_p - hidden
    w1t = jnp.pad(w1.T.astype(jnp.float32), ((0, pad), (0, 0)))   # [hidden_p, in_dim]
    b1c = jnp.pad(b1.astype(jnp.float32), (0, pad)).reshape(hidden_p, 1)
    w2t = jnp.pad(w2.T.astype(jnp.float32), ((0, 0), (0, pad)))   # [out_dim, hidden_p]
    b2c = b2.astype(jnp.float32).reshape(out_dim, 1)
    return w1t, b1c, w2t, b2c


def _pick_batch_tile(batch):
    """Lane-dim batch tile: divides B, multiple of 128 (or == B), >=2 grid steps when possible."""
    if batch % 128 != 0:
        return batch                         # small/odd batch: one full-extent block
    for cand in (512, 384, 256, 128):
        if batch % cand == 0 and batch // cand >= 2:
            return cand                      # lane-aligned with >= 2 grid steps (v7x 2 TCs)
    return batch                             # e.g. B == 128: one lane-aligned block


def odef_forward(t, x, prepared_params, *, batch_tile=None):
    """Pallas-fused ODEF forward.  `t` is ignored (matches the torch module).

    x: [B, in_dim]  ->  returns [B, out_dim]
    prepared_params: output of prepare_params() (do this once, not per solver step).
    """
    del t
    w1t, b1c, w2t, b2c = prepared_params
    B, in_dim = x.shape
    hidden_p = w1t.shape[0]
    out_dim = w2t.shape[0]

    tb = _pick_batch_tile(B) if batch_tile is None else batch_tile
    assert B % tb == 0, "batch must be divisible by the batch tile"
    assert tb % 128 == 0 or tb == B, "lane tile must be 128-aligned or the full batch"

    xT = x.T                                  # [in_dim, B]  batch on lanes
    grid = (B // tb,)

    yT = pl.pallas_call(
        odef_kernel,
        out_shape=jax.ShapeDtypeStruct((out_dim, B), x.dtype),
        grid_spec=pltpu.PrefetchScalarGridSpec(
            num_scalar_prefetch=0,
            grid=grid,
            in_specs=[
                pl.BlockSpec((in_dim, tb), lambda i: (0, i)),         # xT tile
                pl.BlockSpec((hidden_p, in_dim), lambda i: (0, 0)),   # W1^T (resident)
                pl.BlockSpec((hidden_p, 1), lambda i: (0, 0)),        # b1 column
                pl.BlockSpec((out_dim, hidden_p), lambda i: (0, 0)),  # W2^T (resident)
                pl.BlockSpec((out_dim, 1), lambda i: (0, 0)),         # b2 column
            ],
            out_specs=pl.BlockSpec((out_dim, tb), lambda i: (0, i)),
        ),
        compiler_params=pltpu.CompilerParams(
            dimension_semantics=("parallel",),   # batch axis shards across TCs on v7x
        ),
    )(xT, w1t, b1c, w2t, b2c)

    return yT.T                               # back to [B, out_dim] for the caller


def init_params(key, in_dim, hidden_dim, out_dim):
    """Deterministic synthetic init (same shapes as the nn.Linear layers)."""
    k1, k2, k3, k4 = jax.random.split(key, 4)
    lim1 = 1.0 / jnp.sqrt(in_dim)
    lim2 = 1.0 / jnp.sqrt(hidden_dim)
    # math layout: y = ReLU(x @ w1 + b1) @ w2 + b2
    w1 = jax.random.uniform(k1, (in_dim, hidden_dim), jnp.float32, -lim1, lim1)
    b1 = jax.random.uniform(k2, (hidden_dim,), jnp.float32, -lim1, lim1)
    w2 = jax.random.uniform(k3, (hidden_dim, out_dim), jnp.float32, -lim2, lim2)
    b2 = jax.random.uniform(k4, (out_dim,), jnp.float32, -lim2, lim2)
    return w1, b1, w2, b2


if __name__ == "__main__":
    # 2D circle ODE: in_dim = out_dim = 2, hidden_dim = 200 (as in the script).
    in_dim, hidden_dim, out_dim = 2, 200, 2
    batch = 256    # small but lane-aligned; gives a 2-step 'parallel' grid

    key = jax.random.PRNGKey(0)
    kp, kx = jax.random.split(key)
    w1, b1, w2, b2 = init_params(kp, in_dim, hidden_dim, out_dim)
    params = prepare_params(w1, b1, w2, b2)            # transpose + pad once

    x = jax.random.normal(kx, (batch, in_dim), jnp.float32)
    t = jnp.float32(0.0)   # ignored, kept for API parity with forward(t, x)

    out = odef_forward(t, x, params)
    out = jax.block_until_ready(out)

    # reference check in plain JAX
    ref = jnp.maximum(x @ w1 + b1, 0.0) @ w2 + b2
    assert out.shape == (batch, out_dim)
    assert jnp.allclose(out, ref, atol=1e-4, rtol=1e-4)

    print("KERNEL_OK")
</pallas_src>

<mosaic_0001>
module attributes {stable_mosaic.version = 11 : i64} {
  func.func @odef_kernel(%arg0: i32, %arg1: memref<2x128xf32, #tpu.memory_space<vmem>>, %arg2: memref<256x2xf32, #tpu.memory_space<vmem>>, %arg3: memref<256x1xf32, #tpu.memory_space<vmem>>, %arg4: memref<2x256xf32, #tpu.memory_space<vmem>>, %arg5: memref<2x1xf32, #tpu.memory_space<vmem>>, %arg6: memref<2x128xf32, #tpu.memory_space<vmem>>) attributes {dimension_semantics = [#tpu.dimension_semantics<parallel>], iteration_bounds = array<i64: 2>, scalar_prefetch = 0 : i64, scratch_operands = 0 : i64, tpu.core_type = #tpu.core_type<tc>, window_params = [{transform_indices = @transform_0, window_bounds = array<i64: 2, 128>}, {pipeline_mode = #tpu.pipeline_mode<synchronous>, transform_indices = @transform_1, window_bounds = array<i64: 256, 2>}, {pipeline_mode = #tpu.pipeline_mode<synchronous>, transform_indices = @transform_2, window_bounds = array<i64: 256, 1>}, {pipeline_mode = #tpu.pipeline_mode<synchronous>, transform_indices = @transform_3, window_bounds = array<i64: 2, 256>}, {pipeline_mode = #tpu.pipeline_mode<synchronous>, transform_indices = @transform_4, window_bounds = array<i64: 2, 1>}, {transform_indices = @transform_5, window_bounds = array<i64: 2, 128>}]} {
    %c0 = arith.constant 0 : index
    %c0_0 = arith.constant 0 : index
    %0 = vector.load %arg1[%c0, %c0_0] : memref<2x128xf32, #tpu.memory_space<vmem>>, vector<2x128xf32>
    %c0_1 = arith.constant 0 : index
    %c0_2 = arith.constant 0 : index
    %1 = vector.load %arg2[%c0_1, %c0_2] : memref<256x2xf32, #tpu.memory_space<vmem>>, vector<256x2xf32>
    %2 = vector.extract_strided_slice %1 {offsets = [0, 0], sizes = [256, 1], strides = [1, 1]} : vector<256x2xf32> to vector<256x1xf32>
    %3 = vector.extract_strided_slice %0 {offsets = [0, 0], sizes = [1, 128], strides = [1, 1]} : vector<2x128xf32> to vector<1x128xf32>
    %4 = vector.broadcast %2 : vector<256x1xf32> to vector<256x128xf32>
    %5 = vector.broadcast %3 : vector<1x128xf32> to vector<256x128xf32>
    %6 = arith.mulf %4, %5 : vector<256x128xf32>
    %7 = vector.extract_strided_slice %1 {offsets = [0, 1], sizes = [256, 1], strides = [1, 1]} : vector<256x2xf32> to vector<256x1xf32>
    %8 = vector.extract_strided_slice %0 {offsets = [1, 0], sizes = [1, 128], strides = [1, 1]} : vector<2x128xf32> to vector<1x128xf32>
    %9 = vector.broadcast %7 : vector<256x1xf32> to vector<256x128xf32>
    %10 = vector.broadcast %8 : vector<1x128xf32> to vector<256x128xf32>
    %11 = arith.mulf %9, %10 : vector<256x128xf32>
    %12 = arith.addf %6, %11 : vector<256x128xf32>
    %c0_3 = arith.constant 0 : index
    %c0_4 = arith.constant 0 : index
    %13 = vector.load %arg3[%c0_3, %c0_4] : memref<256x1xf32, #tpu.memory_space<vmem>>, vector<256x1xf32>
    %14 = vector.broadcast %13 : vector<256x1xf32> to vector<256x128xf32>
    %15 = arith.addf %12, %14 : vector<256x128xf32>
    %cst = arith.constant 0.000000e+00 : f32
    %16 = vector.broadcast %cst : f32 to vector<256x128xf32>
    %17 = arith.maximumf %15, %16 : vector<256x128xf32>
    %c0_5 = arith.constant 0 : index
    %c0_6 = arith.constant 0 : index
    %18 = vector.load %arg4[%c0_5, %c0_6] : memref<2x256xf32, #tpu.memory_space<vmem>>, vector<2x256xf32>
    %cst_7 = arith.constant dense<0.000000e+00> : vector<2x128xf32>
    %19 = tpu.matmul %18, %17, %cst_7 {dimension_numbers = #tpu.dot_dimension_numbers<[1], [0], [0], [1], [0, 0, 1, 1], [], []>} : vector<2x256xf32>, vector<256x128xf32>, vector<2x128xf32> -> vector<2x128xf32>
    %c0_8 = arith.constant 0 : index
    %c0_9 = arith.constant 0 : index
    %20 = vector.load %arg5[%c0_8, %c0_9] : memref<2x1xf32, #tpu.memory_space<vmem>>, vector<2x1xf32>
    %21 = vector.broadcast %20 : vector<2x1xf32> to vector<2x128xf32>
    %22 = arith.addf %19, %21 : vector<2x128xf32>
    %c0_10 = arith.constant 0 : index
    %c0_11 = arith.constant 0 : index
    %23 = vector.load %arg6[%c0_10, %c0_11] : memref<2x128xf32, #tpu.memory_space<vmem>>, vector<2x128xf32>
    tpu.vector_store %arg6[%c0_10, %c0_11], %22 {strides = array<i32>} : memref<2x128xf32, #tpu.memory_space<vmem>>, vector<2x128xf32>,
    return
  }
  func.func @transform_0(%arg0: i32) -> (i32, i32) {
    %c0_i32 = arith.constant 0 : i32
    %c0_i32_0 = arith.constant 0 : i32
    return %c0_i32, %arg0 : i32, i32
  }
  func.func @transform_1(%arg0: i32) -> (i32, i32) {
    %c0_i32 = arith.constant 0 : i32
    %c0_i32_0 = arith.constant 0 : i32
    %c0_i32_1 = arith.constant 0 : i32
    return %c0_i32, %c0_i32_0 : i32, i32
  }
  func.func @transform_2(%arg0: i32) -> (i32, i32) {
    %c0_i32 = arith.constant 0 : i32
    %c0_i32_0 = arith.constant 0 : i32
    %c0_i32_1 = arith.constant 0 : i32
    return %c0_i32, %c0_i32_0 : i32, i32
  }
  func.func @transform_3(%arg0: i32) -> (i32, i32) {
    %c0_i32 = arith.constant 0 : i32
    %c0_i32_0 = arith.constant 0 : i32
    %c0_i32_1 = arith.constant 0 : i32
    return %c0_i32, %c0_i32_0 : i32, i32
  }
  func.func @transform_4(%arg0: i32) -> (i32, i32) {
    %c0_i32 = arith.constant 0 : i32
    %c0_i32_0 = arith.constant 0 : i32
    %c0_i32_1 = arith.constant 0 : i32
    return %c0_i32, %c0_i32_0 : i32, i32
  }
  func.func @transform_5(%arg0: i32) -> (i32, i32) {
    %c0_i32 = arith.constant 0 : i32
    %c0_i32_0 = arith.constant 0 : i32
    return %c0_i32, %arg0 : i32, i32
  }
}

</mosaic_0001>

<bundles_post_ra>
// kernel: tpu_custom_call.1
= control target key start
LH: loop header
LB: loop body
LE: loop exit
PB: predicated region body
PF: predicated region fallthrough
CT: control target
= control target key end

     0   :  { %10 = vsyncpa [#allocation3], 0  ;;  %s1854_s0 = inlined_call_operand.vmem [shape: f32[2,256], index: 0, kind: input, shape index: {}]   ;;  %s1855_s1 = inlined_call_operand.vmem [shape: f32[256,2], index: 1, kind: input, shape index: {}]   ;;  %s1856_s2 = inlined_call_operand.vmem [shape: f32[256,1], index: 2, kind: input, shape index: {}]   ;;  %s1857_s3 = inlined_call_operand.vmem [shape: f32[2,256], index: 3, kind: input, shape index: {}]   ;;  %s1858_s4 = inlined_call_operand.vmem [shape: f32[2,1], index: 4, kind: input, shape index: {}]   ;;  %s1859_s5 = inlined_call_operand.hbm [shape: f32[2,256], index: 5, kind: output, shape index: {}]  }
   0x1   :  { %12 = vsyncpa [#allocation3 + $0x1], 0  ;;  %s1268_s18 = smov 0   ;;  %s1270_s19 = smov 0  }
   0x2   :  { %s1272_s20 = smov 0   ;;  %s1274_s21 = smov 0  }
   0x3 LB: > { %s1289_s22 = sadd.s32 4294967295, %s1233_s21   ;;  %s1063_s23 = sadd.s32 4294967294, %s1233_s21   ;;  %s1233_s21 = sphi %s1274_s21, %s1875_s21   ;;  %s1229_s20 = sphi %s1272_s20, %s1874_s20   ;;  %s1225_s19 = sphi %s1270_s19, %s1873_s19   ;;  %s1221_s18 = sphi %s1268_s18, %s1872_s18  }
   0x4   : > { %s1293_s24 = sadd.s32 1, %s1233_s21   ;;  %s135_s25 = sadd.s32 1, %s1229_s20 }
   0x5   : > { %s132_s26 = ssub.s32 %s1233_s21, %s1293_s24  ;;  %p145_p0 = scmp.ne.s32.totalorder %s1229_s20, %s1225_s19 }
   0x6   : > { %p133_p1 = scmp.eq.s32.totalorder %s132_s26, 0  ;;  %p146_p2 = scmp.eq.s32.totalorder %s1289_s22, 1 }
   0x7   : > { %p151_p3 = scmp.ne.s32.totalorder %s1225_s19, %s1221_s18  ;;  %p152_p4 = scmp.eq.s32.totalorder %s1063_s23, 1 }
   0x8   : > { %s1304_s27 = scalar_select %p133_p1, %s1229_s20, %s135_s25  }
   0x9   : > { %p1306_p5 = por %p146_p2, %p145_p0  ;;  %p1310_p6 = por %p152_p4, %p151_p3 }
   0xa   : > { %p1066_p7 = scmp.ge.s32.totalorder %s1233_s21, 1  ;;  %p189_p8 = scmp.lt.s32.totalorder %s1233_s21, 3 }
   0xc   : > { %p190_p9 = pnand %p1066_p7, %p189_p8 }
   0xe   : > { %193 = sbr.rel (%p190_p9) target bundleno = 606 (0x25e), region = 40 }
  0x13   : > { %v236_v0 = vld [vmem:[%s1855_s1 + $0x78] sm:$0xff]  ;;  %v1322_v1 = vld [vmem:[%s1855_s1 + $0x10] sm:$0xff]  ;;  %v1235_v2 = vmov 1   ;;  %v1236_v3 = vmov 0   ;;  %v250_v6 = vld [vmem:[%s1855_s1 + $0xe8] sm:$0xff]  ;;  %p216_p10 = scmp.lt.s32.totalorder %s1289_s22, 1 }
  0x14   : > { %1152 = vset.pattern.permute.xlu0 %v1235_v2  ;;  %1150 = vset.pattern.permute.xlu1 %v1236_v3  ;;  %v1330_v4 = vld [vmem:[%s1855_s1 + $0x70] sm:$0xff]  ;;  %v224_v5 = vld [vmem:[%s1855_s1 + $0x18] sm:$0xff]  ;;  %v1342_v7 = vld [vmem:[%s1855_s1 + $0x28] sm:$0xff]  ;;  %s213_s14 = sand.u32 1, %s1225_s19   ;;  %s1071_s16 = sshll.u32 %s1289_s22, 5 }
  0x15   : > { %510 = vperm.xlu0 %1152, %v236_v0   ;;  %265 = vperm.xlu1 %1150, %v1322_v1   ;;  %v234_v8 = vld [vmem:[%s1855_s1 + $0x68] sm:$0xff]  ;;  %v228_v9 = vld [vmem:[%s1855_s1 + $0x38] sm:$0xff]  ;;  %v1354_v10 = vld [vmem:[%s1855_s1 + $0x60] sm:$0xff]  ;;  %s217_s25 = scalar_select %p216_p10, %s1289_s22, 1 }
  0x16   : > { %v230_v11 = vld [vmem:[%s1855_s1 + $0x48] sm:$0xff]  ;;  %v248_v12 = vld [vmem:[%s1855_s1 + $0xd8] sm:$0xff]  ;;  %v231_v14 = vld [vmem:[%s1855_s1 + $0x50] sm:$0xff]  ;;  %s1067_s15 = sshll.u32 %s213_s14, 1  ;;  %s1002_s30 = scalar_lea.hbm %s1859_s5, %s1071_s16 }
  0x17   : > { %v232_v13 = vld [vmem:[%s1855_s1 + $0x58] sm:$0xff]  ;;  %v1372_v15 = vld [vmem:[%s1855_s1 + $0xc8] sm:$0xff]  ;;  %v229_v18 = vld [vmem:[%s1855_s1 + $0x40] sm:$0xff]  ;;  %s1068_s6 = sshll.u32 %s217_s25, 1  ;;  %s215_s17 = scalar_lea.vmem [#allocation2], %s1067_s15 }
  0x18   : > { %v238_v16 = vld [vmem:[%s1855_s1 + $0x88] sm:$0xff]  ;;  %v1381_v17 = vld [vmem:[%s1855_s1 + $0x98] sm:$0xff]  ;;  %v251_v22 = vld [vmem:[%s1855_s1 + $0xf0] sm:$0xff]  ;;  %s219_s9 = scalar_lea.vmem %s1854_s0, %s1068_s6  ;;  %s1004_s23 = sshll.u32 %s215_s17, 4  ;;  %s1005_s23 = int_to_ptr.vmem [resolvable:$true] %s1004_s23 }
  0x19   : > { %506 = vperm.xlu0 %1152, %v1330_v4   ;;  %270 = vperm.xlu1 %1150, %v224_v5   ;;  %v1390_v19 = vld [vmem:[%s1855_s1 + $0xa8] sm:$0xff]  ;;  %v1396_v20 = vld [vmem:[%s1855_s1 + $0xb8] sm:$0xff]  ;;  %v227_v23 = vld [vmem:[%s1855_s1 + $0x30] sm:$0xff]  ;;  %s991_s6 = scalar_lea.sflag [#allocation3], %s213_s14  ;;  %s1173_s7 = scalar_lea.vmem %s1005_s23, 32 }
  0x1a   : > { %v1401_v21 = vld [vmem:[%s1855_s1 + $0xf8] sm:$0xff]  ;;  %v241_v24 = vld [vmem:[%s1855_s1 + $0xa0] sm:$0xff]  ;;  %v1435_v29 = vld [vmem:[%s1855_s1 + $0x8] sm:$0xff]  ;;  %p1174_p11 = scmp.ne.s32.totalorder %s1005_s23, %s1173_s7  ;;  %s1237_s8 = smov [#allocation2]  }
  0x1b   : > { %v676_v25 = vld [vmem:[%s1856_s2 + $0xf8] sm:$0xff]  ;;  %v221_v27 = vld [vmem:[%s1855_s1] sm:$0xff]  ;;  %v675_v30 = vld [vmem:[%s1856_s2 + $0xf0] sm:$0xff] }
  0x1c   : > { %v660_v26 = vld [vmem:[%s1856_s2 + $0x78] sm:$0xff]  ;;  %v249_v28 = vld [vmem:[%s1855_s1 + $0xe0] sm:$0xff]  ;;  %v659_v32 = vld [vmem:[%s1856_s2 + $0x70] sm:$0xff]  ;;  %p1175_p12 = pnand %p1174_p11, %p1306_p5 }
  0x1d   : > { %566 = vperm.xlu0 %1152, %v250_v6   ;;  %280 = vperm.xlu1 %1150, %v1342_v7   ;;  %v1445_v31 = vld [vmem:[%s1855_s1 + $0x20] sm:$0xff]  ;;  %v674_v33 = vld [vmem:[%s1856_s2 + $0xe8] sm:$0xff]  ;;  %v247_v35 = vld [vmem:[%s1855_s1 + $0xd0] sm:$0xff] }
  0x1e   : > { %v658_v34 = vld [vmem:[%s1856_s2 + $0x68] sm:$0xff]  ;;  %v673_v36 = vld [vmem:[%s1856_s2 + $0xe0] sm:$0xff]  ;;  %v1479_v39 = vld [vmem:[%s1855_s1 + $0x90] sm:$0xff]  ;;  %p1176_p13 = pneg %p1175_p12 }
  0x1f   : > { %v1469_v37 = vld [vmem:[%s1855_s1 + $0x80] sm:$0xff]  ;;  %v672_v40 = vld [vmem:[%s1856_s2 + $0xd8] sm:$0xff]  ;;  %v671_v47 = vld [vmem:[%s1856_s2 + $0xd0] sm:$0xff] }
  0x20   : > { %v657_v38 = vld [vmem:[%s1856_s2 + $0x60] sm:$0xff]  ;;  %v656_v41 = vld [vmem:[%s1856_s2 + $0x58] sm:$0xff]  ;;  %v243_v48 = vld [vmem:[%s1855_s1 + $0xb0] sm:$0xff] }
  0x21   : > { %502 = vperm.xlu0 %1152, %v234_v8   ;;  %290 = vperm.xlu1 %1150, %v228_v9   ;;  %v245_v42 = vld [vmem:[%s1855_s1 + $0xc0] sm:$0xff]  ;;  %v655_v51 = vld [vmem:[%s1856_s2 + $0x50] sm:$0xff]  ;;  %v668_v52 = vld [vmem:[%s1856_s2 + $0xb8] sm:$0xff] }
  0x22   : > { %v651_v55 = vld [vmem:[%s1856_s2 + $0x30] sm:$0xff]  ;;  %v670_v58 = vld [vmem:[%s1856_s2 + $0xc8] sm:$0xff]  ;;  %v665_v59 = vld [vmem:[%s1856_s2 + $0xa0] sm:$0xff] }
  0x23   : > { %v654_v62 = vld [vmem:[%s1856_s2 + $0x48] sm:$0xff]  ;;  %v648_v63 = vld [vmem:[%s1856_s2 + $0x18] sm:$0xff] }
  0x25   : > { %498 = vperm.xlu0 %1152, %v1354_v10   ;;  %300 = vperm.xlu1 %1150, %v230_v11  }
  0x29   : > { %558 = vperm.xlu0 %1152, %v248_v12   ;;  %310 = vperm.xlu1 %1150, %v232_v13  }
  0x2d   : > { %494 = vperm.xlu0 %1152, %v232_v13   ;;  %320 = vperm.xlu1 %1150, %v234_v8   ;;  %v653_v13 = vld [vmem:[%s1856_s2 + $0x40] sm:$0xff] }
  0x31   : > { %490 = vperm.xlu0 %1152, %v231_v14   ;;  %330 = vperm.xlu1 %1150, %v236_v0  }
  0x35   : > { %550 = vperm.xlu0 %1152, %v1372_v15   ;;  %340 = vperm.xlu1 %1150, %v238_v16  }
  0x39   : > { %486 = vperm.xlu0 %1152, %v230_v11   ;;  %350 = vperm.xlu1 %1150, %v1381_v17  }
  0x3d   : > { %482 = vperm.xlu0 %1152, %v229_v18   ;;  %360 = vperm.xlu1 %1150, %v1390_v19  }
  0x41   : > { %542 = vperm.xlu0 %1152, %v1396_v20   ;;  %1151 = vset.pattern.permute.xlu1 %v1235_v2 }
  0x42   : > { %574 = vperm.xlu1 %1151, %v1401_v21  }
  0x45   : > { %478 = vperm.xlu0 %1152, %v228_v9   ;;  %v669_v9 = vld [vmem:[%s1856_s2 + $0xc0] sm:$0xff] }
  0x46   : > { %1153 = vset.pattern.permute.xlu1 %v1236_v3 }
  0x47   : > { %405 = vperm.xlu1 %1153, %v251_v22  }
  0x49   : > { %474 = vperm.xlu0 %1152, %v227_v23  }
  0x4b   : > { %1154 = vset.pattern.permute.xlu1 %v1235_v2 }
  0x4c   : > { %570 = vperm.xlu1 %1154, %v251_v22  }
  0x4d   : > { %530 = vperm.xlu0 %1152, %v241_v24  }
  0x50   : > { %1155 = vset.pattern.permute.xlu1 %v1236_v3 }
  0x51   : > { %462 = vperm.xlu0 %1152, %v224_v5   ;;  %400 = vperm.xlu1 %1155, %v250_v6   ;;  %v646_v5 = vld [vmem:[%s1856_s2 + $0x8] sm:$0xff] }
  0x55   : > { %518 = vperm.xlu0 %1152, %v238_v16   ;;  %834 = vperm.xlu1 %1155, %v676_v25   ;;  %v413_v25 = vlaneseq }
  0x59   : > { %754 = vperm.xlu1 %1155, %v660_v26   ;;  %450 = vperm.xlu0 %1152, %v221_v27   ;;  %v667_v26 = vld [vmem:[%s1856_s2 + $0xb0] sm:$0xff] }
  0x5d   : > { %1156 = vset.pattern.permute.xlu1 %v1235_v2  ;;  %1172 = vset.pattern.permute.xlu0 %v1236_v3 }
  0x5e   : > { %562 = vperm.xlu1 %1156, %v249_v28   ;;  %255 = vperm.xlu0 %1172, %v221_v27  }
  0x62   : > { %1157 = vset.pattern.permute.xlu1 %v1236_v3  ;;  %260 = vperm.xlu0 %1172, %v1435_v29  }
  0x63   : > { %829 = vperm.xlu1 %1157, %v675_v30  }
  0x66   : > { %275 = vperm.xlu0 %1172, %v1445_v31  }
  0x67   : > { %749 = vperm.xlu1 %1157, %v659_v32  }
  0x6a   : > { %285 = vperm.xlu0 %1172, %v227_v23   ;;  %v652_v23 = vld [vmem:[%s1856_s2 + $0x38] sm:$0xff] }
  0x6b   : > { %390 = vperm.xlu1 %1157, %v248_v12  }
  0x6e   : > { %295 = vperm.xlu0 %1172, %v229_v18  }
  0x6f   : > { %824 = vperm.xlu1 %1157, %v674_v33   ;;  %v220_v33 = vld [vmem:[%s219_s9] sm:$0x3]  ;;  %s1177_s9 = sshll.u32 %s1237_s8, 4  ;;  %s1178_s9 = int_to_ptr.vmem [resolvable:$false] %s1177_s9 }
  0x70   : > { %s1179_s22 = scalar_lea.vmem %s1178_s9, 64  ;;  %p1180_p0 = scmp.lt.s32.totalorder %s1005_s23, %s1178_s9 }
  0x71   : > { %p1181_p1 = scmp.lt.s32.totalorder %s1179_s22, %s1173_s7 }
  0x72   : > { %305 = vperm.xlu0 %1172, %v231_v14  }
  0x73   : > { %744 = vperm.xlu1 %1157, %v658_v34   ;;  %p1182_p2 = por %p1181_p1, %p1180_p0 }
  0x75   : > { %p1183_p3 = pnand %p1182_p2, %p1176_p13 }
  0x76   : > { %315 = vperm.xlu0 %1172, %v1354_v10   ;;  %v902_v10 = vld [vmem:[%s1858_s4] sm:$0x3] }
  0x77   : > { %1158 = vset.pattern.permute.xlu1 %v1235_v2 }
  0x78   : > { %554 = vperm.xlu1 %1158, %v247_v35  }
  0x7a   : > { %325 = vperm.xlu0 %1172, %v1330_v4  }
  0x7c   : > { %1159 = vset.pattern.permute.xlu1 %v1236_v3 }
  0x7d   : > { %819 = vperm.xlu1 %1159, %v673_v36  }
  0x7e   : > { %335 = vperm.xlu0 %1172, %v1469_v37  }
  0x81   : > { %739 = vperm.xlu1 %1159, %v657_v38  }
  0x82   : > { %345 = vperm.xlu0 %1172, %v1479_v39  }
  0x85   : > { %380 = vperm.xlu1 %1159, %v1372_v15  }
  0x86   : > { %355 = vperm.xlu0 %1172, %v241_v24  }
  0x89   : > { %814 = vperm.xlu1 %1159, %v672_v40  }
  0x8a   : > { %410 = vperm.xlu0 %1172, %v1401_v21  }
  0x8d   : > { %734 = vperm.xlu1 %1159, %v656_v41  }
  0x8e   : > { %395 = vperm.xlu0 %1172, %v249_v28  }
  0x90   : > { %v1493_v43 = vpop.permute.xlu0 %510  ;;  %v1495_v44 = vpop.permute.xlu1 %265 }
  0x91   : > { %1862 = vst [vmem:[#allocation5_spill] sm:$0xff] %v1495_v44  ;;  %1160 = vset.pattern.permute.xlu1 %v1235_v2 }
  0x92   : > { %546 = vperm.xlu1 %1160, %v245_v42   ;;  %385 = vperm.xlu0 %1172, %v247_v35  }
  0x94   : > { %v1498_v45 = vpop.permute.xlu0 %506  ;;  %v1500_v46 = vpop.permute.xlu1 %270 }
  0x96   : > { %1161 = vset.pattern.permute.xlu1 %v1236_v3  ;;  %375 = vperm.xlu0 %1172, %v245_v42  }
  0x97   : > { %809 = vperm.xlu1 %1161, %v671_v47  }
  0x98   : > { %v1509_v49 = vpop.permute.xlu0 %566  ;;  %v1511_v50 = vpop.permute.xlu1 %280 }
  0x9a   : > { %365 = vperm.xlu0 %1172, %v243_v48  }
  0x9b   : > { %729 = vperm.xlu1 %1161, %v655_v51  }
  0x9c   : > { %v1519_v53 = vpop.permute.xlu0 %502  ;;  %v1521_v54 = vpop.permute.xlu1 %290 }
  0x9e   : > { %794 = vperm.xlu0 %1172, %v668_v52  }
  0x9f   : > { %370 = vperm.xlu1 %1161, %v1396_v20  }
  0xa0   : > { %v1527_v56 = vpop.permute.xlu0 %498  ;;  %v1529_v57 = vpop.permute.xlu1 %300 }
  0xa2   : > { %709 = vperm.xlu0 %1172, %v651_v55  }
  0xa3   : > { %804 = vperm.xlu1 %1161, %v670_v58  }
  0xa4   : > { %v1537_v60 = vpop.permute.xlu0 %558  ;;  %v1539_v61 = vpop.permute.xlu1 %310 }
  0xa6   : > { %779 = vperm.xlu0 %1172, %v665_v59  }
  0xa7   : > { %724 = vperm.xlu1 %1161, %v654_v62  }
  0xa8   : > { %v1547_v0 = vpop.permute.xlu0 %494  ;;  %v1549_v4 = vpop.permute.xlu1 %320 }
  0xaa   : > { %694 = vperm.xlu0 %1172, %v648_v63  }
  0xab   : > { %1162 = vset.pattern.permute.xlu1 %v1235_v2 }
  0xac   : > { %v1555_v6 = vpop.permute.xlu0 %490  ;;  %538 = vperm.xlu1 %1162, %v243_v48   ;;  %v1557_v8 = vpop.permute.xlu1 %330  ;;  %v666_v48 = vld [vmem:[%s1856_s2 + $0xa8] sm:$0xff] }
  0xae   : > { %684 = vperm.xlu0 %1172, %v646_v5  }
  0xb0   : > { %v1565_v11 = vpop.permute.xlu0 %550  ;;  %1163 = vset.pattern.permute.xlu1 %v1236_v3  ;;  %v341_v12 = vpop.permute.xlu1 %340 }
  0xb1   : > { %799 = vperm.xlu1 %1163, %v669_v9  }
  0xb2   : > { %905 = vperm.xlu0 %1172, %v902_v10  }
  0xb4   : > { %v1571_v14 = vpop.permute.xlu0 %486  ;;  %v1573_v15 = vpop.permute.xlu1 %350 }
  0xb5   : > { %719 = vperm.xlu1 %1163, %v653_v13  }
  0xb8   : > { %v1575_v16 = vpop.permute.xlu0 %482  ;;  %v1577_v18 = vpop.permute.xlu1 %360 }
  0xb9   : > { %1164 = vset.pattern.permute.xlu1 %v1235_v2 }
  0xba   : > { %534 = vperm.xlu1 %1164, %v1390_v19  }
  0xbc   : > { %v1581_v20 = vpop.permute.xlu0 %542 }
  0xbd   : > { %v1583_v21 = vpop.permute.xlu1 %574 }
  0xbe   : > { %470 = vperm.xlu1 %1164, %v1342_v7   ;;  %v414_v7 = vshrl.u32 %v413_v25, 7 }
  0xc0   : > { %v1587_v22 = vpop.permute.xlu0 %478  ;;  %v579_v30 = vsub.s32 1, %v414_v7  ;;  %v415_v32 = vsub.s32 0, %v414_v7 }
  0xc2   : > { %1165 = vset.pattern.permute.xlu1 %v1236_v3  ;;  %v1594_v24 = vpop.permute.xlu1 %405  ;;  %v1612_v36 = vrot.slane %v220_v33, %v579_v30  ;;  %v1614_v38 = vrot.slane %v220_v33, %v415_v32 }
  0xc3   : > { %714 = vperm.xlu1 %1165, %v652_v23   ;;  %v649_v23 = vld [vmem:[%s1856_s2 + $0x20] sm:$0xff] }
  0xc4   : > { %v475_v19 = vpop.permute.xlu0 %474  ;;  %v434_v42 = vmul.f32 %v1614_v38, %v341_v12  ;;  %v589_v7 = vmul.f32 %v1612_v36, %v1575_v16 }
  0xc5   : > { %v587_v13 = vmul.f32 %v1612_v36, %v475_v19 }
  0xc7   : > { %789 = vperm.xlu1 %1165, %v667_v26   ;;  %v1599_v27 = vpop.permute.xlu1 %570 }
  0xc8   : > { %v1601_v28 = vpop.permute.xlu0 %530 }
  0xcb   : > { %1166 = vset.pattern.permute.xlu1 %v1235_v2 }
  0xcc   : > { %v1607_v34 = vpop.permute.xlu0 %462  ;;  %466 = vperm.xlu1 %1166, %v1445_v31   ;;  %v1610_v35 = vpop.permute.xlu1 %400 }
  0xd0   : > { %v519_v40 = vpop.permute.xlu0 %518  ;;  %526 = vperm.xlu1 %1166, %v1381_v17   ;;  %v1617_v41 = vpop.permute.xlu1 %834  ;;  %v650_v17 = vld [vmem:[%s1856_s2 + $0x28] sm:$0xff] }
  0xd1   : > { %v598_v47 = vmul.f32 %v1612_v36, %v519_v40 }
  0xd3   : > { %v1624_v31 = vadd.f32 %v598_v47, %v434_v42 }
  0xd4   : > { %1167 = vset.pattern.permute.xlu1 %v1236_v3  ;;  %v1627_v51 = vpop.permute.xlu1 %754  ;;  %v451_v52 = vpop.permute.xlu0 %450 }
  0xd5   : > { %1863 = vst [vmem:[#allocation6_spill] sm:$0xff] %v1624_v31  ;;  %784 = vperm.xlu1 %1167, %v666_v48   ;;  %v581_v55 = vmul.f32 %v1612_v36, %v451_v52 }
  0xd9   : > { %704 = vperm.xlu1 %1167, %v650_v17   ;;  %v1633_v58 = vpop.permute.xlu1 %562  ;;  %v256_v59 = vpop.permute.xlu0 %255  ;;  %v663_v17 = vld [vmem:[%s1856_s2 + $0x90] sm:$0xff] }
  0xda   : > { %v417_v62 = vmul.f32 %v1614_v38, %v256_v59 }
  0xdc   : > { %v1636_v63 = vadd.f32 %v581_v55, %v417_v62  ;;  %v662_v62 = vld [vmem:[%s1856_s2 + $0x88] sm:$0xff] }
  0xdd   : > { %1168 = vset.pattern.permute.xlu1 %v1235_v2  ;;  %v1639_v5 = vpop.permute.xlu0 %260 }
  0xde   : > { %1864 = vst [vmem:[#allocation7_spill] sm:$0xff] %v1636_v63  ;;  %1865 = vst [vmem:[#allocation8_spill] sm:$0xff] %v1639_v5  ;;  %522 = vperm.xlu1 %1168, %v1479_v39   ;;  %v1642_v9 = vpop.permute.xlu1 %829 }
  0xe1   : > { %v1644_v10 = vpop.permute.xlu0 %275 }
  0xe2   : > { %458 = vperm.xlu1 %1168, %v1322_v1   ;;  %v1647_v12 = vpop.permute.xlu1 %749  ;;  %v664_v1 = vld [vmem:[%s1856_s2 + $0x98] sm:$0xff] }
  0xe5   : > { %v286_v25 = vpop.permute.xlu0 %285 }
  0xe6   : > { %v423_v26 = vmul.f32 %v1614_v38, %v286_v25  ;;  %1169 = vset.pattern.permute.xlu1 %v1236_v3  ;;  %v1655_v39 = vpop.permute.xlu1 %390 }
  0xe7   : > { %699 = vperm.xlu1 %1169, %v649_v23   ;;  %v601_v23 = vmul.f32 %v1612_v36, %v1601_v28  ;;  %v610_v28 = vmul.f32 %v1612_v36, %v1509_v49  ;;  %v430_v49 = vmul.f32 %v1614_v38, %v1549_v4 }
  0xe8   : > { %v1662_v19 = vadd.f32 %v587_v13, %v423_v26  ;;  %v661_v26 = vld [vmem:[%s1856_s2 + $0x80] sm:$0xff] }
  0xe9   : > { %v296_v30 = vpop.permute.xlu0 %295 }
  0xea   : > { %v425_v32 = vmul.f32 %v1614_v38, %v296_v30  ;;  %v1665_v33 = vpop.permute.xlu1 %824  ;;  %v611_v30 = vmul.f32 %v1612_v36, %v1599_v27  ;;  %v594_v27 = vmul.f32 %v1612_v36, %v1519_v53 }
  0xeb   : > { %774 = vperm.xlu1 %1169, %v664_v1   ;;  %v432_v1 = vmul.f32 %v1614_v38, %v1557_v8  ;;  %v447_v8 = vmul.f32 %v1614_v38, %v1594_v24  ;;  %v1734_v24 = vld.sshfl [vmem:[%s1857_s3] sm:$0x33 pattern:$0x76325410] }
  0xec   : > { %v1667_v40 = vadd.f32 %v589_v7, %v425_v32  ;;  %v596_v7 = vmul.f32 %v1612_v36, %v1493_v43  ;;  %v595_v43 = vmul.f32 %v1612_v36, %v1498_v45  ;;  %v645_v45 = vld [vmem:[%s1856_s2] sm:$0xff]  ;;  %v916_v4 = vcombine.high %v1734_v24, %v1734_v24 }
  0xed   : > { %v1669_v42 = vpop.permute.xlu0 %305 }
  0xee   : > { %v1671_v47 = vpop.permute.xlu1 %744  ;;  %983 = vmatprep.mubr.f32.mxu0 %v916_v4 }
  0xef   : > { %1170 = vset.pattern.permute.xlu1 %v1235_v2  ;;  %v647_v2 = vld [vmem:[%s1856_s2 + $0x10] sm:$0xff] }
  0xf0   : > { %454 = vperm.xlu1 %1170, %v1435_v29  }
  0xf1   : > { %v316_v16 = vpop.permute.xlu0 %315 }
  0xf2   : > { %v429_v5 = vmul.f32 %v1614_v38, %v316_v16  ;;  %v626_v16 = vadd.f32 %v594_v27, %v430_v49 }
  0xf3   : > { %v1675_v48 = vpop.permute.xlu1 %554 }
  0xf4   : > { %514 = vperm.xlu1 %1170, %v1469_v37  }
  0xf5   : > { %v326_v52 = vpop.permute.xlu0 %325 }
  0xf6   : > { %v431_v32 = vmul.f32 %v1614_v38, %v326_v52 }
  0xf8   : > { %v1681_v55 = vpop.permute.xlu1 %819  ;;  %1171 = vset.pattern.permute.xlu1 %v1236_v3  ;;  %v627_v53 = vadd.f32 %v595_v43, %v431_v32 }
  0xf9   : > { %769 = vperm.xlu1 %1171, %v663_v17   ;;  %v1684_v59 = vpop.permute.xlu0 %335  ;;  %v446_v17 = vmul.f32 %v1614_v38, %v1610_v35  ;;  %v612_v35 = vmul.f32 %v1612_v36, %v1583_v21  ;;  %v608_v21 = vmul.f32 %v1612_v36, %v1537_v60 }
  0xfa   : > { %1866 = vst [vmem:[#allocation9_spill] sm:$0xff] %v1684_v59  ;;  %v851_v32 = vadd.f32 %v1647_v12, %v627_v53 }
  0xfc   : > { %v1689_v29 = vpop.permute.xlu1 %739 }
  0xfd   : > { %689 = vperm.xlu1 %1171, %v647_v2   ;;  %v1691_v37 = vpop.permute.xlu0 %345 }
 0x100   : > { %v1696_v13 = vpop.permute.xlu1 %380 }
 0x101   : > { %764 = vperm.xlu1 %1171, %v662_v62   ;;  %v356_v3 = vpop.permute.xlu0 %355 }
 0x102   : > { %v437_v25 = vmul.f32 %v1614_v38, %v356_v3 }
 0x104   : > { %v815_v2 = vpop.permute.xlu1 %814  ;;  %v1715_v62 = vadd.f32 %v601_v23, %v437_v25  ;;  %v628_v23 = vadd.f32 %v596_v7, %v432_v1  ;;  %v643_v25 = vadd.f32 %v611_v30, %v447_v8  ;;  %v609_v7 = vmul.f32 %v1612_v36, %v1633_v58 }
 0x105   : > { %759 = vperm.xlu1 %1171, %v661_v26   ;;  %v411_v3 = vpop.permute.xlu0 %410  ;;  %v642_v26 = vadd.f32 %v610_v28, %v446_v17  ;;  %v444_v1 = vmul.f32 %v1614_v38, %v1655_v39  ;;  %v428_v28 = vmul.f32 %v1614_v38, %v1539_v61 }
 0x106   : > { %v448_v52 = vmul.f32 %v1614_v38, %v411_v3  ;;  %v852_v31 = vadd.f32 %v1627_v51, %v628_v23  ;;  %v867_v59 = vadd.f32 %v1642_v9, %v643_v25  ;;  %v593_v51 = vmul.f32 %v1612_v36, %v1527_v56 }
 0x107   : > { %v592_v9 = vmul.f32 %v1612_v36, %v1547_v0  ;;  %v866_v58 = vadd.f32 %v1665_v33, %v642_v26  ;;  %v607_v0 = vmul.f32 %v1612_v36, %v1675_v48  ;;  %v640_v27 = vadd.f32 %v608_v21, %v444_v1 }
 0x108   : > { %v735_v3 = vpop.permute.xlu1 %734  ;;  %v644_v63 = vadd.f32 %v612_v35, %v448_v52  ;;  %v884_v43 = vmax.f32 %v852_v31, 0.0  ;;  %v883_v31 = vmax.f32 %v851_v32, 0.0 }
 0x109   : > { %679 = vperm.xlu1 %1171, %v645_v45   ;;  %v396_v44 = vpop.permute.xlu0 %395  ;;  %v624_v49 = vadd.f32 %v592_v9, %v428_v28  ;;  %v864_v35 = vadd.f32 %v815_v2, %v640_v27  ;;  %v426_v9 = vmul.f32 %v1614_v38, %v1529_v57  ;;  %v604_v57 = vmul.f32 %v1612_v36, %v1581_v20 }
 0x10a   : > { %v445_v60 = vmul.f32 %v1614_v38, %v396_v44  ;;  %v868_v30 = vadd.f32 %v1617_v41, %v644_v63  ;;  %v899_v44 = vmax.f32 %v867_v59, 0.0  ;;  %v850_v41 = vadd.f32 %v1671_v47, %v626_v16 }
 0x10b   : > { %v625_v63 = vadd.f32 %v593_v51, %v429_v5  ;;  %v898_v59 = vmax.f32 %v866_v58, 0.0  ;;  %v427_v47 = vmul.f32 %v1614_v38, %v1669_v42  ;;  %v848_v48 = vadd.f32 %v735_v3, %v624_v49 }
 0x10c   : > { %v641_v17 = vadd.f32 %v609_v7, %v445_v60  ;;  %v900_v39 = vmax.f32 %v868_v30, 0.0  ;;  %v882_v52 = vmax.f32 %v850_v41, 0.0  ;;  %v896_v53 = vmax.f32 %v864_v35, 0.0 }
 0x10d   : > { %v547_v8 = vpop.permute.xlu1 %546  ;;  %v386_v56 = vpop.permute.xlu0 %385  ;;  %v849_v33 = vadd.f32 %v1689_v29, %v625_v63  ;;  %v880_v2 = vmax.f32 %v848_v48, 0.0  ;;  %v442_v3 = vmul.f32 %v1614_v38, %v1696_v13  ;;  %v590_v60 = vmul.f32 %v1612_v36, %v1571_v14 }
 0x10e   : > { %v443_v12 = vmul.f32 %v1614_v38, %v386_v56  ;;  %1074 = vmatprep.subr.mxu0 %v900_v39  ;;  %v865_v61 = vadd.f32 %v1681_v55, %v641_v17  ;;  %v591_v55 = vmul.f32 %v1612_v36, %v1555_v6  ;;  %v606_v6 = vmul.f32 %v1612_v36, %v1565_v11 }
 0x10f   : > { %1075 = vmatpush3.msra.mxu0 %v884_v43  ;;  %v881_v29 = vmax.f32 %v849_v33, 0.0  ;;  %v622_v28 = vadd.f32 %v590_v60, %v426_v9  ;;  %v605_v14 = vmul.f32 %v1612_v36, %v547_v8  ;;  %v588_v8 = vmul.f32 %v1612_v36, %v1587_v22 }
 0x110   : > { %1076 = vmatprep.subr.mxu0 %v899_v44  ;;  %v639_v5 = vadd.f32 %v607_v0, %v443_v12  ;;  %v897_v23 = vmax.f32 %v865_v61, 0.0  ;;  %v623_v21 = vadd.f32 %v591_v55, %v427_v47  ;;  %v638_v30 = vadd.f32 %v606_v6, %v442_v3 }
 0x111   : > { %1077 = vmatpush3.msra.mxu0 %v883_v31  ;;  %v376_v17 = vpop.permute.xlu0 %375  ;;  %v424_v47 = vmul.f32 %v1614_v38, %v1521_v54  ;;  %v438_v3 = vmul.f32 %v1614_v38, %v1577_v18 }
 0x112   : > { %v810_v45 = vpop.permute.xlu1 %809  ;;  %1078 = vmatprep.subr.mxu0 %v898_v59  ;;  %v441_v43 = vmul.f32 %v1614_v38, %v376_v17 }
 0x113   : > { %v863_v25 = vadd.f32 %v810_v45, %v639_v5  ;;  %1079 = vmatpush3.msra.mxu0 %v882_v52  ;;  %v620_v45 = vadd.f32 %v588_v8, %v424_v47 }
 0x114   : > { %1080 = vmatprep.subr.mxu0 %v897_v23  ;;  %v637_v63 = vadd.f32 %v605_v14, %v441_v43  ;;  %v584_v43 = vmul.f32 %v1612_v36, %v1607_v34 }
 0x115   : > { %v895_v4 = vmax.f32 %v863_v25, 0.0  ;;  %1081 = vmatpush3.msra.mxu0 %v881_v29  ;;  %v366_v41 = vpop.permute.xlu0 %365 }
 0x116   : > { %v730_v26 = vpop.permute.xlu1 %729  ;;  %1082 = vmatprep.subr.mxu0 %v896_v53  ;;  %v439_v52 = vmul.f32 %v1614_v38, %v366_v41  ;;  %v436_v41 = vmul.f32 %v1614_v38, %v1573_v15  ;;  %v435_v15 = vmul.f32 %v1614_v38, %v1691_v37 }
 0x117   : > { %v847_v42 = vadd.f32 %v730_v26, %v623_v21  ;;  %1083 = vmatpush3.msra.mxu0 %v880_v2 }
 0x118   : > { %1084 = vmatprep.subr.mxu0 %v895_v4 }
 0x119   : > { %v879_v7 = vmax.f32 %v847_v42, 0.0  ;;  %v795_v12 = vpop.permute.xlu0 %794 }
 0x11a   : > { %v371_v1 = vpop.permute.xlu1 %370 }
 0x11b   : > { %1085 = vmatpush3.msra.mxu0 %v879_v7  ;;  %v440_v44 = vmul.f32 %v1614_v38, %v371_v1 }
 0x11d   : > { %v636_v56 = vadd.f32 %v604_v57, %v440_v44  ;;  %v420_v44 = vmul.f32 %v1614_v38, %v1500_v46 }
 0x11e   : > { %v805_v51 = vpop.permute.xlu1 %804 }
 0x11f   : > { %v862_v16 = vadd.f32 %v805_v51, %v638_v30  ;;  %v860_v49 = vadd.f32 %v795_v12, %v636_v56  ;;  %v616_v56 = vadd.f32 %v584_v43, %v420_v44 }
 0x121   : > { %v894_v32 = vmax.f32 %v862_v16, 0.0  ;;  %v892_v35 = vmax.f32 %v860_v49, 0.0 }
 0x122   : > { %v725_v58 = vpop.permute.xlu1 %724 }
 0x123   : > { %v846_v13 = vadd.f32 %v725_v58, %v622_v28  ;;  %1086 = vmatprep.subr.mxu0 %v894_v32 }
 0x125   : > { %v878_v39 = vmax.f32 %v846_v13, 0.0 }
 0x127   : > { %v539_v11 = vpop.permute.xlu1 %538  ;;  %1087 = vmatpush3.msra.mxu0 %v878_v39 }
 0x128   : > { %v603_v48 = vmul.f32 %v1612_v36, %v539_v11 }
 0x12a   : > { %v635_v25 = vadd.f32 %v603_v48, %v439_v52  ;;  %v1868_v48 = vld [vmem:[#allocation8_spill] sm:$0xff] }
 0x12c   : > { %v800_v0 = vpop.permute.xlu1 %799 }
 0x12d   : > { %v861_v27 = vadd.f32 %v800_v0, %v637_v63 }
 0x12f   : > { %v893_v61 = vmax.f32 %v861_v27, 0.0 }
 0x130   : > { %v720_v33 = vpop.permute.xlu1 %719 }
 0x131   : > { %v845_v31 = vadd.f32 %v720_v33, %v1667_v40  ;;  %1088 = vmatprep.subr.mxu0 %v893_v61  ;;  %v710_v40 = vpop.permute.xlu0 %709 }
 0x132   : > { %v843_v53 = vadd.f32 %v710_v40, %v1662_v19  ;;  %v422_v19 = vmul.f32 %v1614_v38, %v1511_v50  ;;  %v421_v50 = vmul.f32 %v1614_v38, %v1644_v10 }
 0x133   : > { %v877_v59 = vmax.f32 %v845_v31, 0.0 }
 0x134   : > { %v875_v21 = vmax.f32 %v843_v53, 0.0 }
 0x135   : > { %v535_v5 = vpop.permute.xlu1 %534  ;;  %1089 = vmatpush3.msra.mxu0 %v877_v59  ;;  %v780_v60 = vpop.permute.xlu0 %779 }
 0x136   : > { %1090 = vmatprep.subr.mxu0 %v892_v35  ;;  %v602_v54 = vmul.f32 %v1612_v36, %v535_v5  ;;  %v857_v16 = vadd.f32 %v780_v60, %v1715_v62 }
 0x138   : > { %v634_v1 = vadd.f32 %v602_v54, %v438_v3  ;;  %v889_v17 = vmax.f32 %v857_v16, 0.0  ;;  %v1870_v54 = vld [vmem:[#allocation6_spill] sm:$0xff] }
 0x139   : > { %v471_v20 = vpop.permute.xlu1 %470  ;;  %v695_v57 = vpop.permute.xlu0 %694 }
 0x13a   : > { %v586_v7 = vmul.f32 %v1612_v36, %v471_v20  ;;  %v840_v12 = vadd.f32 %v695_v57, %v616_v56  ;;  %v1867_v20 = vld [vmem:[#allocation5_spill] sm:$0xff] }
 0x13b   : > { %v419_v47 = vmul.f32 %v1614_v38, %v1867_v20 }
 0x13c   : > { %v618_v9 = vadd.f32 %v586_v7, %v422_v19  ;;  %v872_v33 = vmax.f32 %v840_v12, 0.0 }
 0x13d   : > { %v685_v37 = vpop.permute.xlu0 %684 }
 0x13e   : > { %v715_v23 = vpop.permute.xlu1 %714 }
 0x13f   : > { %v844_v55 = vadd.f32 %v715_v23, %v620_v45  ;;  %v418_v45 = vmul.f32 %v1614_v38, %v1868_v48 }
 0x141   : > { %v876_v29 = vmax.f32 %v844_v55, 0.0 }
 0x142   : > { %v790_v2 = vpop.permute.xlu1 %789 }
 0x143   : > { %v859_v4 = vadd.f32 %v790_v2, %v635_v25  ;;  %1091 = vmatpush3.msra.mxu0 %v876_v29 }
 0x145   : > { %v891_v22 = vmax.f32 %v859_v4, 0.0 }
 0x147   : > { %v467_v26 = vpop.permute.xlu1 %466  ;;  %1092 = vmatprep.subr.mxu0 %v891_v22 }
 0x148   : > { %1093 = vmatpush3.msra.mxu0 %v875_v21  ;;  %v585_v18 = vmul.f32 %v1612_v36, %v467_v26  ;;  %v1869_v21 = vld [vmem:[#allocation9_spill] sm:$0xff] }
 0x149   : > { %v433_v26 = vmul.f32 %v1614_v38, %v1869_v21 }
 0x14a   : > { %v617_v62 = vadd.f32 %v585_v18, %v421_v50 }
 0x14b   : > { %v527_v42 = vpop.permute.xlu1 %526 }
 0x14c   : > { %v600_v11 = vmul.f32 %v1612_v36, %v527_v42 }
 0x14e   : > { %v632_v27 = vadd.f32 %v600_v11, %v436_v41 }
 0x150   : > { %v785_v6 = vpop.permute.xlu1 %784 }
 0x151   : > { %v858_v30 = vadd.f32 %v785_v6, %v634_v1 }
 0x153   : > { %v890_v51 = vmax.f32 %v858_v30, 0.0  ;;  %v1871_v30 = vld [vmem:[#allocation7_spill] sm:$0xff] }
 0x154   : > { %v705_v32 = vpop.permute.xlu1 %704 }
 0x155   : > { %v842_v28 = vadd.f32 %v705_v32, %v618_v9  ;;  %1094 = vmatprep.subr.mxu0 %v890_v51 }
 0x157   : > { %v874_v58 = vmax.f32 %v842_v28, 0.0  ;;  %v906_v28 = vpop.permute.xlu0 %905 }
 0x159   : > { %v523_v13 = vpop.permute.xlu1 %522  ;;  %1095 = vmatpush3.msra.mxu0 %v874_v58 }
 0x15a   : > { %1096 = vmatprep.subr.mxu0 %v889_v17  ;;  %v599_v46 = vmul.f32 %v1612_v36, %v523_v13 }
 0x15c   : > { %v631_v35 = vadd.f32 %v599_v46, %v435_v15 }
 0x15d   : > { %v459_v39 = vpop.permute.xlu1 %458 }
 0x15e   : > { %v583_v59 = vmul.f32 %v1612_v36, %v459_v39 }
 0x160   : > { %v615_v40 = vadd.f32 %v583_v59, %v419_v47 }
 0x162   : > { %v700_v14 = vpop.permute.xlu1 %699 }
 0x163   : > { %v841_v63 = vadd.f32 %v700_v14, %v617_v62 }
 0x165   : > { %v873_v0 = vmax.f32 %v841_v63, 0.0 }
 0x166   : > { %v775_v10 = vpop.permute.xlu1 %774 }
 0x167   : > { %v856_v61 = vadd.f32 %v775_v10, %v632_v27  ;;  %1097 = vmatpush3.msra.mxu0 %v873_v0 }
 0x169   : > { %v888_v34 = vmax.f32 %v856_v61, 0.0 }
 0x16b   : > { %v455_v49 = vpop.permute.xlu1 %454  ;;  %1098 = vmatprep.subr.mxu0 %v888_v34 }
 0x16c   : > { %1099 = vmatpush3.msra.mxu0 %v872_v33  ;;  %v582_v5 = vmul.f32 %v1612_v36, %v455_v49 }
 0x16e   : > { %v614_v55 = vadd.f32 %v582_v5, %v418_v45 }
 0x16f   : > { %v515_v31 = vpop.permute.xlu1 %514 }
 0x170   : > { %v597_v53 = vmul.f32 %v1612_v36, %v515_v31  ;;  %v838_v22 = vadd.f32 %v685_v37, %v614_v55 }
 0x172   : > { %v629_v7 = vadd.f32 %v597_v53, %v433_v26  ;;  %v870_v6 = vmax.f32 %v838_v22, 0.0 }
 0x174   : > { %v770_v8 = vpop.permute.xlu1 %769 }
 0x175   : > { %v855_v52 = vadd.f32 %v770_v8, %v631_v35 }
 0x177   : > { %v887_v23 = vmax.f32 %v855_v52, 0.0 }
 0x178   : > { %v690_v29 = vpop.permute.xlu1 %689 }
 0x179   : > { %v839_v25 = vadd.f32 %v690_v29, %v615_v40  ;;  %1100 = vmatprep.subr.mxu0 %v887_v23 }
 0x17b   : > { %v871_v2 = vmax.f32 %v839_v25, 0.0 }
 0x17c   : > { %v765_v4 = vpop.permute.xlu1 %764 }
 0x17d   : > { %v854_v42 = vadd.f32 %v765_v4, %v1870_v54  ;;  %1101 = vmatpush3.msra.mxu0 %v871_v2 }
 0x17f   : > { %v886_v3 = vmax.f32 %v854_v42, 0.0 }
 0x180   : > { %v760_v1 = vpop.permute.xlu1 %759 }
 0x181   : > { %v853_v19 = vadd.f32 %v760_v1, %v629_v7  ;;  %1102 = vmatprep.subr.mxu0 %v886_v3 }
 0x182   : > { %1103 = vmatpush3.msra.mxu0 %v870_v6 }
 0x183   : > { %v885_v60 = vmax.f32 %v853_v19, 0.0 }
 0x184   : > { %v680_v36 = vpop.permute.xlu1 %679 }
 0x185   : > { %v837_v51 = vadd.f32 %v680_v36, %v1871_v30  ;;  %1104 = vmatprep.subr.mxu0 %v885_v60 }
 0x187   : > { %v869_v9 = vmax.f32 %v837_v51, 0.0 }
 0x189   : > { %1105 = vmatpush3.msra.mxu0 %v869_v9 }
 0x18a   : > { %984 = vmatmul.mubr.f32.vlgmr.msra.gmra.mxu0 %v1734_v24 }
 0x24a   : > { %v1106_v38 = vpop.f32.mrf.mxu0 }
 0x24c   : > { %v1107_v16 = vpop.f32.mrf.mxu0 }
 0x24d   : > { %v1108_v32 = vadd.f32 %v1107_v16, %v1106_v38 }
 0x24f   : > { %v986_v58 = vadd.f32 %v1108_v32, %v906_v28 }
 0x251   : > { %989 = vst [vmem:[%s215_s17] sm:$0x3] %v986_v58 }
 0x252   : > { %1186 = shalt.err (!%p1183_p3)
}
 0x253   : > { %s1187_s10 = scalar_lea.hbm %s1002_s30, 32  ;;  %s1191_s13 = scalar_lea.hbm %s1859_s5, 64 }
 0x254   : > { %p1188_p4 = scmp.ne.s32.totalorder %s1002_s30, %s1187_s10  ;;  %p1192_p9 = scmp.lt.s32.totalorder %s1002_s30, %s1859_s5 }
 0x255   : > { %p1193_p10 = scmp.lt.s32.totalorder %s1191_s13, %s1187_s10 }
 0x256   : > { %p1189_p7 = pnand %p1188_p4, %p1306_p5 }
 0x257   : > { %p1194_p11 = por %p1193_p10, %p1192_p9 }
 0x258   : > { %p1190_p8 = pneg %p1189_p7 }
 0x25a   : > { %p1195_p12 = pnand %p1194_p11, %p1190_p8 }
 0x25c   : > { %1198 = shalt.err (!%p1195_p12)
}
 0x25d   : > { %1109 = dma.vmem_to_hbm [thread:$0]  (%p1306_p5), %s1005_s23, 32, %s1002_s30, %s991_s6  }
 0x25e PF: > { %p1115_p13 = scmp.ge.s32.totalorder %s1233_s21, 2  ;;  %s1016_s16 = sand.u32 1, %s1221_s18  }
 0x25f   : > { %s1017_s17 = scalar_lea.sflag [#allocation3], %s1016_s16 }
 0x260   : > { %p1112_p0 = pnand %p1115_p13, %p1310_p6 }
 0x262   : > { %p1113_p1 = pneg %p1112_p0 }
 0x264   : > { %1216 = dma.done.wait (%p1113_p1), %s1017_s17, 32  }
 0x265   : > { %1218 = vsyncadd (%p1113_p1), %s1017_s17, 4294967264  ;;  %p15_p2 = scmp.ge.s32.totalorder %s1293_s24, 4   ;;  %s1872_s18 = smov %s1225_s19 }
 0x266   : > { %s1873_s19 = smov %s1229_s20  ;;  %s1874_s20 = smov %s1304_s27 }
 0x267   : > { %s1875_s21 = smov %s1293_s24  ;;  %17 = sbr.rel (!%p15_p2) target bundleno = 3 (0x3), region = 75 }
 0x26c   :  { %1022 = vsyncpa [#allocation3], 1 }
 0x26d   :  { %1024 = vsyncpa [#allocation3 + $0x1], 1 }

</bundles_post_ra>
